<compile_context>
chip_gen: v7x
topology: tpu7x:2x2x1
jax: 0.10.0
libtpu: 0.0.40
codegen_flags: <defaults>
</compile_context>

<pallas_src>
import math
import numpy as np
import jax
import jax.numpy as jnp
from jax.experimental import pallas as pl
from jax.experimental.pallas import tpu as pltpu


# ---------------------------------------------------------------------------
# Wavelet filters + analysis-matrix construction (faithful port of get_matrix()).
# Deterministic in-script Haar filters (== pywt.Wavelet('haar').rec_lo/rec_hi).
# ---------------------------------------------------------------------------
HAAR_REC_LO = [1.0 / math.sqrt(2.0), 1.0 / math.sqrt(2.0)]
HAAR_REC_HI = [1.0 / math.sqrt(2.0), -1.0 / math.sqrt(2.0)]
_INV_SQRT2 = 1.0 / math.sqrt(2.0)


def dwt3d_matrices(D, H, W, band_low, band_high):
    """Port of DWT_3D.get_matrix (numpy, float64)."""
    band_length = len(band_low)
    assert band_length == len(band_high) and band_length % 2 == 0
    band_length_half = band_length // 2

    L1 = max(H, W)
    L = L1 // 2
    matrix_h = np.zeros((L, L1 + band_length - 2), dtype=np.float64)
    matrix_g = np.zeros((L1 - L, L1 + band_length - 2), dtype=np.float64)
    end = None if band_length_half == 1 else (-band_length_half + 1)

    index = 0
    for i in range(L):
        for j in range(band_length):
            matrix_h[i, index + j] = band_low[j]
        index += 2
    matrix_h_0 = matrix_h[0:H // 2, 0:H + band_length - 2]
    matrix_h_1 = matrix_h[0:W // 2, 0:W + band_length - 2]
    matrix_h_2 = matrix_h[0:D // 2, 0:D + band_length - 2]

    index = 0
    for i in range(L1 - L):
        for j in range(band_length):
            matrix_g[i, index + j] = band_high[j]
        index += 2
    matrix_g_0 = matrix_g[0:H - H // 2, 0:H + band_length - 2]
    matrix_g_1 = matrix_g[0:W - W // 2, 0:W + band_length - 2]
    matrix_g_2 = matrix_g[0:D - D // 2, 0:D + band_length - 2]

    matrix_h_0 = matrix_h_0[:, band_length_half - 1:end]
    matrix_h_1 = np.transpose(matrix_h_1[:, band_length_half - 1:end])
    matrix_h_2 = matrix_h_2[:, band_length_half - 1:end]
    matrix_g_0 = matrix_g_0[:, band_length_half - 1:end]
    matrix_g_1 = np.transpose(matrix_g_1[:, band_length_half - 1:end])
    matrix_g_2 = matrix_g_2[:, band_length_half - 1:end]

    # (low_0, low_1, low_2, high_0, high_1, high_2) = (H, W, D) low / high
    return (matrix_h_0, matrix_h_1, matrix_h_2,
            matrix_g_0, matrix_g_1, matrix_g_2)


# ---------------------------------------------------------------------------
# Pallas kernel: VPU Haar D-stage + two lane-dense MXU matmuls per grid step.
# ---------------------------------------------------------------------------
def _make_dwt3d_kernel(hw):
    def kernel(x_ref, r_ref, out_ref):
        # x_ref:   (Bt*Dh, 2*H*W)   lanes [0,HW) = d=2r slice, [HW,2HW) = d=2r+1 slice
        # r_ref:   (H*W, 4*Hh*Wh)   fused H/W analysis matrix, sub-band-contiguous columns
        # out_ref: (2, Bt*Dh, 4*Hh*Wh)  leading axis = D-filter bit (0 = low, 1 = high)
        even = x_ref[:, :hw]
        odd = x_ref[:, hw:]
        low = (even + odd) * _INV_SQRT2      # Haar D-axis low  (VPU; overlaps MXU work)
        high = (even - odd) * _INV_SQRT2     # Haar D-axis high
        r = r_ref[...]
        out_ref[0] = jnp.dot(low, r, preferred_element_type=jnp.float32)
        out_ref[1] = jnp.dot(high, r, preferred_element_type=jnp.float32)
    return kernel


def _vmem_capacity_bytes():
    try:
        return int(pltpu.get_tpu_info().vmem_capacity_bytes)
    except Exception:
        return 64 << 20   # conservative default (v7x per-core VMEM)


def _pick_bt(B, Dh, per_b_bytes, fixed_bytes, budget_bytes):
    """Pick the per-grid-step batch tile Bt (a divisor of B).

    Constraints: VMEM fit, and sublane alignment (Bt*Dh % 8 == 0, or full extent).
    Preference: keep the MXU M dimension filled (Bt*Dh >= 128 per sub-band matmul)
    while leaving >= 4 grid steps (2 per v7x TensorCore, so the pipeline can
    overlap DMA with compute).  At tiny problem sizes where the MXU cannot be
    filled anyway, the ~0.35us fixed per-step overhead dominates sub-microsecond
    DMAs, so the largest fitting tile (fewest steps) wins.
    """
    divs = [d for d in range(1, B + 1)
            if B % d == 0
            and ((d * Dh) % 8 == 0 or d == B)
            and fixed_bytes + d * per_b_bytes <= budget_bytes]
    if not divs:
        return B
    tier1 = [d for d in divs if d * Dh >= 128 and B // d >= 4]
    if tier1:
        return max(tier1)
    tier2 = [d for d in divs if d * Dh >= 128 and B // d >= 2]
    if tier2:
        return max(tier2)
    return max(divs)


def dwt_3d(x, wavename="haar", use_bf16=False):
    """JAX/Pallas equivalent of DWT_3D(wavename)(x); x: (N, C, D, H, W) float32.

    Returns (LLL, LLH, LHL, LHH, HLL, HLH, HHL, HHH), each (N, C, D/2, H/2, W/2).
    """
    assert wavename == "haar"
    assert x.ndim == 5
    N, C, D, H, W = x.shape
    assert D % 2 == 0 and H % 2 == 0 and W % 2 == 0
    Dh, Hh, Wh = D // 2, H // 2, W // 2
    B = N * C
    HW = H * W
    F4 = 4 * Hh * Wh      # == H*W for even H, W; output lane width (all 4 H/W sub-bands)

    ml0, ml1, ml2, mh0, mh1, mh2 = dwt3d_matrices(D, H, W, HAAR_REC_LO, HAAR_REC_HI)

    # Fused H/W analysis matrix (RHS) so the MXU result is lane-dense.  Columns are
    # permuted so each (h_bit, w_bit) sub-band occupies a CONTIGUOUS block of Hh*Wh
    # columns: col = (2*h_bit + w_bit)*Hh*Wh + p*Wh + q.  The 8-way split in the
    # wrapper is then a cheap contiguous slice instead of a strided lane gather.
    mh_stack = np.concatenate([ml0, mh0], axis=0)            # (2*Hh, H): rows [0,Hh)=low
    mw_cat = np.concatenate([ml1, mh1], axis=1)              # (W, 2*Wh): cols [0,Wh)=low
    r_mat = np.kron(mh_stack.T, mw_cat)                      # (HW, 2Hh*2Wh)
    r_mat = (r_mat.reshape(HW, 2, Hh, 2, Wh)
                  .transpose(0, 1, 3, 2, 4)
                  .reshape(HW, F4))

    in_dtype = jnp.bfloat16 if use_bf16 else jnp.float32
    # Free reshape: row = b*Dh + r, lanes [0,HW) = x[b, 2r], lanes [HW,2HW) = x[b, 2r+1]
    x2d = jnp.asarray(x, in_dtype).reshape(B * Dh, 2 * HW)
    r_arr = jnp.asarray(r_mat.astype(np.float32), in_dtype)

    # --- generation-aware tiling / VMEM sizing ------------------------------------
    vmem_cap = _vmem_capacity_bytes()
    itemsize = 2 if use_bf16 else 4
    fixed_bytes = 2 * HW * F4 * itemsize                     # R (double-buffered; never re-DMA'd)
    per_b_bytes = Dh * (2 * 2 * HW * itemsize                # x block, double-buffered
                        + 2 * 2 * F4 * 4                     # out block (f32), double-buffered
                        + 2 * HW * itemsize + 2 * F4 * 4)    # live low/high operands + dot results
    Bt = _pick_bt(B, Dh, per_b_bytes, fixed_bytes, budget_bytes=int(0.4 * vmem_cap))
    need_bytes = fixed_bytes + Bt * per_b_bytes
    vmem_limit = int(min(0.85 * vmem_cap, max(need_bytes + (8 << 20), 32 << 20)))

    cost = pl.CostEstimate(
        flops=4 * B * Dh * HW * F4 + 6 * B * Dh * HW,
        transcendentals=0,
        bytes_accessed=(B * Dh * 2 * HW + HW * F4) * itemsize + 2 * B * Dh * F4 * 4,
    )

    out = pl.pallas_call(
        _make_dwt3d_kernel(HW),
        out_shape=jax.ShapeDtypeStruct((2, B * Dh, F4), jnp.float32),
        grid=(B // Bt,),
        in_specs=[
            pl.BlockSpec((Bt * Dh, 2 * HW), lambda i: (i, 0)),    # Bt batch slabs
            pl.BlockSpec((HW, F4), lambda i: (0, 0)),             # fused H/W matrix (grid-invariant)
        ],
        out_specs=pl.BlockSpec((2, Bt * Dh, F4), lambda i: (0, i, 0)),
        compiler_params=pltpu.CompilerParams(
            dimension_semantics=("parallel",),
            vmem_limit_bytes=vmem_limit),
        cost_estimate=cost,
    )(x2d, r_arr)

    # 8-way sub-band split (pure glue, outside the kernel), all contiguous slices:
    #   out[d_bit, b*Dh + r, (2*h_bit + w_bit)*Hh*Wh + p*Wh + q]
    out7 = out.reshape(2, N, C, Dh, 4, Hh, Wh)
    return tuple(out7[k >> 2, :, :, :, k & 3, :, :] for k in range(8))


# ---------------------------------------------------------------------------
# Pure-numpy float64 reference (direct transcription of the separable transform).
# ---------------------------------------------------------------------------
def _dwt_3d_reference(x):
    x64 = np.asarray(x, np.float64)
    N, C, D, H, W = x64.shape
    ml0, ml1, ml2, mh0, mh1, mh2 = dwt3d_matrices(D, H, W, HAAR_REC_LO, HAAR_REC_HI)
    Mh = (ml0, mh0)   # H axis (H/2, H)
    Mw = (ml1, mh1)   # W axis (W, W/2)
    Md = (ml2, mh2)   # D axis (D/2, D)
    outs = []
    for k in range(8):
        d_bit, h_bit, w_bit = (k >> 2) & 1, (k >> 1) & 1, k & 1
        outs.append(np.einsum("rd,ph,wq,ncdhw->ncrpq",
                              Md[d_bit], Mh[h_bit], Mw[w_bit], x64))
    return outs


if __name__ == "__main__":
    key = jax.random.PRNGKey(0)
    N, C, D, H, W = 2, 4, 16, 16, 16
    x = jax.random.normal(key, (N, C, D, H, W), dtype=jnp.float32)

    outs = jax.block_until_ready(dwt_3d(x, wavename="haar"))

    refs = _dwt_3d_reference(np.asarray(x))
    for o, r in zip(outs, refs):
        assert o.shape == (N, C, D // 2, H // 2, W // 2)
        np.testing.assert_allclose(np.asarray(o), r, rtol=1e-4, atol=1e-4)

    print("KERNEL_OK")
</pallas_src>

<mosaic_0001>
module attributes {stable_mosaic.version = 11 : i64} {
  func.func @kernel(%arg0: i32, %arg1: memref<64x512xf32, #tpu.memory_space<vmem>>, %arg2: memref<256x256xf32, #tpu.memory_space<vmem>>, %arg3: memref<2x64x256xf32, #tpu.memory_space<vmem>>) attributes {dimension_semantics = [#tpu.dimension_semantics<parallel>], iteration_bounds = array<i64: 1>, scalar_prefetch = 0 : i64, scratch_operands = 0 : i64, tpu.core_type = #tpu.core_type<tc>, window_params = [{transform_indices = @transform_0, window_bounds = array<i64: 64, 512>}, {pipeline_mode = #tpu.pipeline_mode<synchronous>, transform_indices = @transform_1, window_bounds = array<i64: 256, 256>}, {transform_indices = @transform_2, window_bounds = array<i64: 2, 64, 256>}]} {
    %c0 = arith.constant 0 : index
    %c0_0 = arith.constant 0 : index
    %0 = vector.load %arg1[%c0, %c0_0] : memref<64x512xf32, #tpu.memory_space<vmem>>, vector<64x256xf32>
    %c0_1 = arith.constant 0 : index
    %c256 = arith.constant 256 : index
    %1 = vector.load %arg1[%c0_1, %c256] : memref<64x512xf32, #tpu.memory_space<vmem>>, vector<64x256xf32>
    %2 = arith.addf %0, %1 : vector<64x256xf32>
    %cst = arith.constant 0.707106769 : f32
    %3 = vector.broadcast %cst : f32 to vector<64x256xf32>
    %4 = arith.mulf %2, %3 : vector<64x256xf32>
    %5 = arith.subf %0, %1 : vector<64x256xf32>
    %cst_2 = arith.constant 0.707106769 : f32
    %6 = vector.broadcast %cst_2 : f32 to vector<64x256xf32>
    %7 = arith.mulf %5, %6 : vector<64x256xf32>
    %c0_3 = arith.constant 0 : index
    %c0_4 = arith.constant 0 : index
    %8 = vector.load %arg2[%c0_3, %c0_4] : memref<256x256xf32, #tpu.memory_space<vmem>>, vector<256x256xf32>
    %cst_5 = arith.constant dense<0.000000e+00> : vector<64x256xf32>
    %9 = tpu.matmul %4, %8, %cst_5 {dimension_numbers = #tpu.dot_dimension_numbers<[1], [0], [0], [1], [0, 0, 1, 1], [], []>} : vector<64x256xf32>, vector<256x256xf32>, vector<64x256xf32> -> vector<64x256xf32>
    %c0_6 = arith.constant 0 : index
    %c0_7 = arith.constant 0 : index
    %c0_8 = arith.constant 0 : index
    %10 = vector.load %arg3[%c0_6, %c0_7, %c0_8] : memref<2x64x256xf32, #tpu.memory_space<vmem>>, vector<1x64x256xf32>
    %11 = vector.shape_cast %10 : vector<1x64x256xf32> to vector<64x256xf32>
    %12 = vector.shape_cast %9 : vector<64x256xf32> to vector<1x64x256xf32>
    tpu.vector_store %arg3[%c0_6, %c0_7, %c0_8], %12 {strides = array<i32>} : memref<2x64x256xf32, #tpu.memory_space<vmem>>, vector<1x64x256xf32>,
    %cst_9 = arith.constant dense<0.000000e+00> : vector<64x256xf32>
    %13 = tpu.matmul %7, %8, %cst_9 {dimension_numbers = #tpu.dot_dimension_numbers<[1], [0], [0], [1], [0, 0, 1, 1], [], []>} : vector<64x256xf32>, vector<256x256xf32>, vector<64x256xf32> -> vector<64x256xf32>
    %c1 = arith.constant 1 : index
    %c0_10 = arith.constant 0 : index
    %c0_11 = arith.constant 0 : index
    %14 = vector.load %arg3[%c1, %c0_10, %c0_11] : memref<2x64x256xf32, #tpu.memory_space<vmem>>, vector<1x64x256xf32>
    %15 = vector.shape_cast %14 : vector<1x64x256xf32> to vector<64x256xf32>
    %16 = vector.shape_cast %13 : vector<64x256xf32> to vector<1x64x256xf32>
    tpu.vector_store %arg3[%c1, %c0_10, %c0_11], %16 {strides = array<i32>} : memref<2x64x256xf32, #tpu.memory_space<vmem>>, vector<1x64x256xf32>,
    return
  }
  func.func @transform_0(%arg0: i32) -> (i32, i32) {
    %c0_i32 = arith.constant 0 : i32
    %c0_i32_0 = arith.constant 0 : i32
    return %arg0, %c0_i32 : i32, i32
  }
  func.func @transform_1(%arg0: i32) -> (i32, i32) {
    %c0_i32 = arith.constant 0 : i32
    %c0_i32_0 = arith.constant 0 : i32
    %c0_i32_1 = arith.constant 0 : i32
    return %c0_i32, %c0_i32_0 : i32, i32
  }
  func.func @transform_2(%arg0: i32) -> (i32, i32, i32) {
    %c0_i32 = arith.constant 0 : i32
    %c0_i32_0 = arith.constant 0 : i32
    %c0_i32_1 = arith.constant 0 : i32
    return %c0_i32, %arg0, %c0_i32_0 : i32, i32, i32
  }
}

</mosaic_0001>

<bundles_post_ra>
// kernel: tpu_custom_call.1
= control target key start
LH: loop header
LB: loop body
LE: loop exit
PB: predicated region body
PF: predicated region fallthrough
CT: control target
= control target key end

     0   :  { %7 = vsyncpa [#allocation3], 0  ;;  %s748_s0 = inlined_call_operand.hbm [shape: f32[64,512], index: 0, kind: input, shape index: {}]   ;;  %s749_s1 = inlined_call_operand.hbm [shape: f32[256,256], index: 1, kind: input, shape index: {}]   ;;  %s750_s2 = inlined_call_operand.hbm [shape: f32[2,64,256], index: 2, kind: output, shape index: {}]  }
   0x1   :  { %8 = vsyncpa [#allocation6], 0 }
   0x2   :  { %9 = vsyncpa [#allocation4], 0  ;;  %s684_s9 = smov [#allocation2]   ;;  %s612_s13 = scalar_lea.hbm %s748_s0, 4096 }
   0x3   :  { %s15_s10 = sshll.u32 %s684_s9, 4  ;;  %p613_p0 = scmp.ne.s32.totalorder %s748_s0, %s612_s13  ;;  %s16_s10 = int_to_ptr.vmem [resolvable:$true] %s15_s10 }
   0x4   :  { %p616_p1 = scmp.lt.u32.totalorder %s612_s13, %s748_s0 }
   0x6   :  { %p618_p2 = pnand %p616_p1, %p613_p0 }
   0x8   :  { %621 = shalt.err (!%p618_p2)
}
   0x9   :  { %s622_s18 = scalar_lea.vmem %s16_s10, 4096  ;;  %p627_p4 = scmp.lt.s32.totalorder %s16_s10, %s16_s10 }
   0xa   :  { %p623_p3 = scmp.ne.s32.totalorder %s16_s10, %s622_s18  ;;  %p628_p5 = scmp.lt.s32.totalorder %s622_s18, %s622_s18 }
   0xc   :  { %p629_p6 = por %p628_p5, %p627_p4 }
   0xe   :  { %p630_p7 = pnand %p629_p6, %p623_p3 }
  0x10   :  { %633 = shalt.err (!%p630_p7)
}
  0x11   :  { %s685_s19 = smov 512   ;;  %s686_s20 = smov 32  }
  0x12   :  { %21 = dma.hbm_to_vmem [thread:$0]  %s748_s0, 4096, %s16_s10, [#allocation3], %s685_s19, %s685_s19, %s686_s20  }
  0x13   :  { %s687_s23 = smov [#allocation5]   ;;  %s634_s27 = scalar_lea.hbm %s749_s1, 8192 }
  0x14   :  { %s27_s24 = sshll.u32 %s687_s23, 4  ;;  %p635_p8 = scmp.ne.s32.totalorder %s749_s1, %s634_s27  ;;  %s28_s24 = int_to_ptr.vmem [resolvable:$true] %s27_s24 }
  0x15   :  { %p638_p9 = scmp.lt.u32.totalorder %s634_s27, %s749_s1 }
  0x17   :  { %p640_p10 = pnand %p638_p9, %p635_p8 }
  0x19   :  { %643 = shalt.err (!%p640_p10)
}
  0x1a   :  { %s644_s4 = scalar_lea.vmem %s28_s24, 8192  ;;  %p649_p12 = scmp.lt.s32.totalorder %s28_s24, %s28_s24 }
  0x1b   :  { %p645_p11 = scmp.ne.s32.totalorder %s28_s24, %s644_s4  ;;  %p650_p13 = scmp.lt.s32.totalorder %s644_s4, %s644_s4 }
  0x1d   :  { %p651_p0 = por %p650_p13, %p649_p12 }
  0x1f   :  { %p652_p1 = pnand %p651_p0, %p645_p11 }
  0x21   :  { %655 = shalt.err (!%p652_p1)
}
  0x22   :  { %s688_s0 = smov 256   ;;  %s689_s5 = smov 16  }
  0x23   :  { %33 = dma.hbm_to_vmem [thread:$0]  %s749_s1, 8192, %s28_s24, [#allocation6], %s688_s0, %s688_s0, %s689_s5  }
  0x24   :  { %678 = dma.done.wait [#allocation3], 4096  }
  0x25   :  { %679 = vsyncadd [#allocation3], 4294963200 }
  0x26   :  { %680 = dma.done.wait [#allocation6], 8192  }
  0x27   :  { %681 = vsyncadd [#allocation6], 4294959104  ;;  %v137_v0 = vld [vmem:[#allocation5 + $0x8] sm:$0xff]  ;;  %v139_v1 = vld [vmem:[#allocation5 + $0x18] sm:$0xff]  ;;  %s690_s1 = smov [#allocation7]  }
  0x28   :  { %v136_v2 = vld [vmem:[#allocation5] sm:$0xff]  ;;  %v477_v3 = vpack.c.bf16 %v139_v1, %v137_v0  ;;  %v138_v4 = vld [vmem:[#allocation5 + $0x10] sm:$0xff]  ;;  %v141_v5 = vld [vmem:[#allocation5 + $0x28] sm:$0xff]  ;;  %s464_s8 = sshll.u32 %s690_s1, 4  ;;  %s465_s8 = int_to_ptr.vmem [resolvable:$true] %s464_s8 }
  0x29   :  { %v143_v6 = vld [vmem:[#allocation5 + $0x38] sm:$0xff]  ;;  %v479_v7 = vpack.c.bf16 %v138_v4, %v136_v2  ;;  %v140_v9 = vld [vmem:[#allocation5 + $0x20] sm:$0xff]  ;;  %v142_v10 = vld [vmem:[#allocation5 + $0x30] sm:$0xff]  ;;  %s656_s9 = scalar_lea.vmem %s465_s8, 4096  ;;  %p661_p3 = scmp.lt.s32.totalorder %s465_s8, %s465_s8 }
  0x2a   :  { %v481_v8 = vpack.c.bf16 %v143_v6, %v141_v5  ;;  %v145_v11 = vld [vmem:[#allocation5 + $0x48] sm:$0xff]  ;;  %478 = vmatprep.subr.bf16.mxu0 %v477_v3  ;;  %542 = vmatprep.subr.bf16.mxu1 %v477_v3  ;;  %v147_v12 = vld [vmem:[#allocation5 + $0x58] sm:$0xff]  ;;  %v483_v13 = vpack.c.bf16 %v142_v10, %v140_v9  ;;  %v144_v15 = vld [vmem:[#allocation5 + $0x40] sm:$0xff]  ;;  %p657_p2 = scmp.ne.s32.totalorder %s465_s8, %s656_s9  ;;  %p662_p4 = scmp.lt.s32.totalorder %s656_s9, %s656_s9 }
  0x2b   :  { %480 = vmatpush1.bf16.msra.mxu0 %v479_v7  ;;  %544 = vmatpush1.bf16.msra.mxu1 %v479_v7  ;;  %v485_v14 = vpack.c.bf16 %v147_v12, %v145_v11  ;;  %v146_v16 = vld [vmem:[#allocation5 + $0x50] sm:$0xff]  ;;  %v149_v17 = vld [vmem:[#allocation5 + $0x68] sm:$0xff]  ;;  %v151_v18 = vld [vmem:[#allocation5 + $0x78] sm:$0xff] }
  0x2c   :  { %482 = vmatprep.subr.bf16.mxu0 %v481_v8  ;;  %546 = vmatprep.subr.bf16.mxu1 %v481_v8  ;;  %v487_v19 = vpack.c.bf16 %v146_v16, %v144_v15  ;;  %v489_v20 = vpack.c.bf16 %v151_v18, %v149_v17  ;;  %v148_v21 = vld [vmem:[#allocation5 + $0x60] sm:$0xff]  ;;  %v150_v22 = vld [vmem:[#allocation5 + $0x70] sm:$0xff]  ;;  %v153_v23 = vld [vmem:[#allocation5 + $0x88] sm:$0xff]  ;;  %p663_p5 = por %p662_p4, %p661_p3 }
  0x2d   :  { %v155_v24 = vld [vmem:[#allocation5 + $0x98] sm:$0xff]  ;;  %v491_v25 = vpack.c.bf16 %v150_v22, %v148_v21  ;;  %v152_v27 = vld [vmem:[#allocation5 + $0x80] sm:$0xff]  ;;  %v154_v28 = vld [vmem:[#allocation5 + $0x90] sm:$0xff] }
  0x2e   :  { %v493_v26 = vpack.c.bf16 %v155_v24, %v153_v23  ;;  %v157_v29 = vld [vmem:[#allocation5 + $0xa8] sm:$0xff]  ;;  %v159_v30 = vld [vmem:[#allocation5 + $0xb8] sm:$0xff]  ;;  %v495_v31 = vpack.c.bf16 %v154_v28, %v152_v27  ;;  %v156_v33 = vld [vmem:[#allocation5 + $0xa0] sm:$0xff]  ;;  %p664_p6 = pnand %p663_p5, %p657_p2 }
  0x2f   :  { %484 = vmatpush1.bf16.msra.mxu0 %v483_v13  ;;  %548 = vmatpush1.bf16.msra.mxu1 %v483_v13  ;;  %v497_v32 = vpack.c.bf16 %v159_v30, %v157_v29  ;;  %v158_v34 = vld [vmem:[#allocation5 + $0xb0] sm:$0xff]  ;;  %v161_v35 = vld [vmem:[#allocation5 + $0xc8] sm:$0xff]  ;;  %v163_v36 = vld [vmem:[#allocation5 + $0xd8] sm:$0xff] }
  0x30   :  { %486 = vmatprep.subr.bf16.mxu0 %v485_v14  ;;  %550 = vmatprep.subr.bf16.mxu1 %v485_v14  ;;  %v499_v37 = vpack.c.bf16 %v158_v34, %v156_v33  ;;  %v160_v38 = vld [vmem:[#allocation5 + $0xc0] sm:$0xff]  ;;  %v501_v39 = vpack.c.bf16 %v163_v36, %v161_v35  ;;  %v162_v40 = vld [vmem:[#allocation5 + $0xd0] sm:$0xff]  ;;  %v41_v41 = vld [vmem:[#allocation2 + $0x8] sm:$0xff] }
  0x31   :  { %v57_v42 = vld [vmem:[#allocation2 + $0x18] sm:$0xff]  ;;  %v165_v43 = vld [vmem:[#allocation5 + $0xe8] sm:$0xff]  ;;  %v503_v47 = vpack.c.bf16 %v162_v40, %v160_v38  ;;  %v164_v51 = vld [vmem:[#allocation5 + $0xe0] sm:$0xff] }
  0x32   :  { %v167_v44 = vld [vmem:[#allocation5 + $0xf8] sm:$0xff]  ;;  %v73_v45 = vadd.f32 %v57_v42, %v41_v41  ;;  %v105_v46 = vsub.f32 %v41_v41, %v57_v42  ;;  %v166_v52 = vld [vmem:[#allocation5 + $0xf0] sm:$0xff]  ;;  %v169_v53 = vld [vmem:[#allocation5 + $0x108] sm:$0xff] }
  0x33   :  { %488 = vmatpush1.bf16.msra.mxu0 %v487_v19  ;;  %552 = vmatpush1.bf16.msra.mxu1 %v487_v19  ;;  %v505_v50 = vpack.c.bf16 %v167_v44, %v165_v43  ;;  %v171_v54 = vld [vmem:[#allocation5 + $0x118] sm:$0xff]  ;;  %v507_v55 = vpack.c.bf16 %v166_v52, %v164_v51  ;;  %v168_v57 = vld [vmem:[#allocation5 + $0x100] sm:$0xff]  ;;  %v170_v58 = vld [vmem:[#allocation5 + $0x110] sm:$0xff] }
  0x34   :  { %490 = vmatprep.subr.bf16.mxu0 %v489_v20  ;;  %554 = vmatprep.subr.bf16.mxu1 %v489_v20  ;;  %v89_v48 = vmul.f32 0.70710677, %v73_v45  ;;  %v121_v49 = vmul.f32 0.70710677, %v105_v46  ;;  %v509_v56 = vpack.c.bf16 %v171_v54, %v169_v53  ;;  %v173_v59 = vld [vmem:[#allocation5 + $0x128] sm:$0xff]  ;;  %v175_v60 = vld [vmem:[#allocation5 + $0x138] sm:$0xff]  ;;  %v511_v61 = vpack.c.bf16 %v170_v58, %v168_v57 }
  0x35   :  { %v513_v62 = vpack.c.bf16 %v175_v60, %v173_v59  ;;  %v172_v63 = vld [vmem:[#allocation5 + $0x120] sm:$0xff]  ;;  %v174_v0 = vld [vmem:[#allocation5 + $0x130] sm:$0xff]  ;;  %v177_v1 = vld [vmem:[#allocation5 + $0x148] sm:$0xff] }
  0x36   :  { %264 = vmatprep.mubr.f32.mxu0 %v89_v48  ;;  %393 = vmatprep.mubr.f32.mxu1 %v121_v49  ;;  %v179_v2 = vld [vmem:[#allocation5 + $0x158] sm:$0xff]  ;;  %v515_v3 = vpack.c.bf16 %v174_v0, %v172_v63  ;;  %v176_v5 = vld [vmem:[#allocation5 + $0x140] sm:$0xff]  ;;  %v178_v6 = vld [vmem:[#allocation5 + $0x150] sm:$0xff] }
  0x37   :  { %492 = vmatpush1.bf16.msra.mxu0 %v491_v25  ;;  %556 = vmatpush1.bf16.msra.mxu1 %v491_v25  ;;  %v517_v4 = vpack.c.bf16 %v179_v2, %v177_v1  ;;  %v181_v7 = vld [vmem:[#allocation5 + $0x168] sm:$0xff]  ;;  %v183_v8 = vld [vmem:[#allocation5 + $0x178] sm:$0xff]  ;;  %v519_v9 = vpack.c.bf16 %v178_v6, %v176_v5  ;;  %v180_v11 = vld [vmem:[#allocation5 + $0x160] sm:$0xff] }
  0x38   :  { %494 = vmatprep.subr.bf16.mxu0 %v493_v26  ;;  %558 = vmatprep.subr.bf16.mxu1 %v493_v26  ;;  %v521_v10 = vpack.c.bf16 %v183_v8, %v181_v7  ;;  %v182_v12 = vld [vmem:[#allocation5 + $0x170] sm:$0xff]  ;;  %v185_v13 = vld [vmem:[#allocation5 + $0x188] sm:$0xff]  ;;  %v187_v14 = vld [vmem:[#allocation5 + $0x198] sm:$0xff] }
  0x39   :  { %v523_v15 = vpack.c.bf16 %v182_v12, %v180_v11  ;;  %v525_v16 = vpack.c.bf16 %v187_v14, %v185_v13  ;;  %v184_v17 = vld [vmem:[#allocation5 + $0x180] sm:$0xff]  ;;  %v186_v18 = vld [vmem:[#allocation5 + $0x190] sm:$0xff]  ;;  %v189_v19 = vld [vmem:[#allocation5 + $0x1a8] sm:$0xff] }
  0x3a   :  { %v191_v20 = vld [vmem:[#allocation5 + $0x1b8] sm:$0xff]  ;;  %v527_v21 = vpack.c.bf16 %v186_v18, %v184_v17  ;;  %v188_v23 = vld [vmem:[#allocation5 + $0x1a0] sm:$0xff]  ;;  %v190_v24 = vld [vmem:[#allocation5 + $0x1b0] sm:$0xff] }
  0x3b   :  { %496 = vmatpush1.bf16.msra.mxu0 %v495_v31  ;;  %560 = vmatpush1.bf16.msra.mxu1 %v495_v31  ;;  %v529_v22 = vpack.c.bf16 %v191_v20, %v189_v19  ;;  %v193_v25 = vld [vmem:[#allocation5 + $0x1c8] sm:$0xff]  ;;  %v195_v26 = vld [vmem:[#allocation5 + $0x1d8] sm:$0xff]  ;;  %v531_v27 = vpack.c.bf16 %v190_v24, %v188_v23  ;;  %v192_v29 = vld [vmem:[#allocation5 + $0x1c0] sm:$0xff] }
  0x3c   :  { %498 = vmatprep.subr.bf16.mxu0 %v497_v32  ;;  %562 = vmatprep.subr.bf16.mxu1 %v497_v32  ;;  %v533_v28 = vpack.c.bf16 %v195_v26, %v193_v25  ;;  %v194_v30 = vld [vmem:[#allocation5 + $0x1d0] sm:$0xff]  ;;  %v197_v31 = vld [vmem:[#allocation5 + $0x1e8] sm:$0xff]  ;;  %v199_v32 = vld [vmem:[#allocation5 + $0x1f8] sm:$0xff] }
  0x3d   :  { %v535_v33 = vpack.c.bf16 %v194_v30, %v192_v29  ;;  %v196_v34 = vld [vmem:[#allocation5 + $0x1e0] sm:$0xff]  ;;  %v56_v36 = vld [vmem:[#allocation2 + $0x10] sm:$0xff]  ;;  %v59_v40 = vld [vmem:[#allocation2 + $0x38] sm:$0xff] }
  0x3e   :  { %v40_v35 = vld [vmem:[#allocation2] sm:$0xff]  ;;  %v198_v38 = vld [vmem:[#allocation5 + $0x1f0] sm:$0xff]  ;;  %v45_v48 = vld [vmem:[#allocation2 + $0x48] sm:$0xff] }
  0x3f   :  { %500 = vmatpush1.bf16.msra.mxu0 %v499_v37  ;;  %564 = vmatpush1.bf16.msra.mxu1 %v499_v37  ;;  %v537_v37 = vpack.c.bf16 %v199_v32, %v197_v31  ;;  %v72_v41 = vadd.f32 %v56_v36, %v40_v35  ;;  %v104_v42 = vsub.f32 %v40_v35, %v56_v36  ;;  %v42_v46 = vld [vmem:[#allocation2 + $0x20] sm:$0xff]  ;;  %v61_v49 = vld [vmem:[#allocation2 + $0x58] sm:$0xff]  ;;  %v60_v59 = vld [vmem:[#allocation2 + $0x50] sm:$0xff] }
  0x40   :  { %502 = vmatprep.subr.bf16.mxu0 %v501_v39  ;;  %566 = vmatprep.subr.bf16.mxu1 %v501_v39  ;;  %v43_v39 = vld [vmem:[#allocation2 + $0x28] sm:$0xff]  ;;  %v539_v43 = vpack.c.bf16 %v198_v38, %v196_v34  ;;  %v109_v57 = vsub.f32 %v45_v48, %v61_v49  ;;  %v44_v58 = vld [vmem:[#allocation2 + $0x40] sm:$0xff]  ;;  %v62_v7 = vld [vmem:[#allocation2 + $0x70] sm:$0xff] }
  0x41   :  { %v75_v44 = vadd.f32 %v59_v40, %v43_v39  ;;  %v107_v45 = vsub.f32 %v43_v39, %v59_v40  ;;  %v120_v51 = vmul.f32 0.70710677, %v104_v42  ;;  %v47_v60 = vld [vmem:[#allocation2 + $0x68] sm:$0xff]  ;;  %v76_v0 = vadd.f32 %v60_v59, %v44_v58  ;;  %v46_v6 = vld [vmem:[#allocation2 + $0x60] sm:$0xff]  ;;  %v64_v19 = vld [vmem:[#allocation2 + $0x90] sm:$0xff] }
  0x42   :  { %v108_v1 = vsub.f32 %v44_v58, %v60_v59  ;;  %v49_v8 = vld [vmem:[#allocation2 + $0x88] sm:$0xff]  ;;  %v78_v12 = vadd.f32 %v62_v7, %v46_v6  ;;  %v110_v13 = vsub.f32 %v46_v6, %v62_v7  ;;  %v48_v18 = vld [vmem:[#allocation2 + $0x80] sm:$0xff]  ;;  %v66_v31 = vld [vmem:[#allocation2 + $0xb0] sm:$0xff] }
  0x43   :  { %504 = vmatpush1.bf16.msra.mxu0 %v503_v47  ;;  %568 = vmatpush1.bf16.msra.mxu1 %v503_v47  ;;  %v58_v47 = vld [vmem:[#allocation2 + $0x30] sm:$0xff]  ;;  %v91_v54 = vmul.f32 0.70710677, %v75_v44  ;;  %v51_v20 = vld [vmem:[#allocation2 + $0xa8] sm:$0xff]  ;;  %v80_v24 = vadd.f32 %v64_v19, %v48_v18  ;;  %v112_v25 = vsub.f32 %v48_v18, %v64_v19  ;;  %v50_v30 = vld [vmem:[#allocation2 + $0xa0] sm:$0xff] }
  0x44   :  { %506 = vmatprep.subr.bf16.mxu0 %v505_v50  ;;  %570 = vmatprep.subr.bf16.mxu1 %v505_v50  ;;  %v88_v50 = vmul.f32 0.70710677, %v72_v41  ;;  %v74_v52 = vadd.f32 %v58_v47, %v42_v46  ;;  %v106_v53 = vsub.f32 %v42_v46, %v58_v47  ;;  %v124_v11 = vmul.f32 0.70710677, %v108_v1  ;;  %v53_v32 = vld [vmem:[#allocation2 + $0xc8] sm:$0xff]  ;;  %v52_v42 = vld [vmem:[#allocation2 + $0xc0] sm:$0xff] }
  0x45   :  { %v126_v23 = vmul.f32 0.70710677, %v110_v13  ;;  %v96_v34 = vmul.f32 0.70710677, %v80_v24  ;;  %v128_v35 = vmul.f32 0.70710677, %v112_v25  ;;  %v82_v36 = vadd.f32 %v66_v31, %v50_v30 }
  0x46   :  { %v122_v63 = vmul.f32 0.70710677, %v106_v53  ;;  %v55_v44 = vld [vmem:[#allocation2 + $0xe8] sm:$0xff] }
  0x47   :  { %508 = vmatpush1.bf16.msra.mxu0 %v507_v55  ;;  %572 = vmatpush1.bf16.msra.mxu1 %v507_v55  ;;  %v123_v55 = vmul.f32 0.70710677, %v107_v45  ;;  %v71_v45 = vld [vmem:[#allocation2 + $0xf8] sm:$0xff]  ;;  %v98_v46 = vmul.f32 0.70710677, %v82_v36 }
  0x48   :  { %510 = vmatprep.subr.bf16.mxu0 %v509_v56  ;;  %574 = vmatprep.subr.bf16.mxu1 %v509_v56  ;;  %v77_v56 = vadd.f32 %v61_v49, %v45_v48  ;;  %v119_v53 = vsub.f32 %v55_v44, %v71_v45 }
  0x4a   :  { %v93_v2 = vmul.f32 0.70710677, %v77_v56 }
  0x4b   :  { %512 = vmatpush1.bf16.msra.mxu0 %v511_v61  ;;  %576 = vmatpush1.bf16.msra.mxu1 %v511_v61  ;;  %v63_v61 = vld [vmem:[#allocation2 + $0x78] sm:$0xff] }
  0x4c   :  { %514 = vmatprep.subr.bf16.mxu0 %v513_v62  ;;  %578 = vmatprep.subr.bf16.mxu1 %v513_v62  ;;  %v90_v62 = vmul.f32 0.70710677, %v74_v52  ;;  %v111_v5 = vsub.f32 %v47_v60, %v63_v61  ;;  %v87_v52 = vadd.f32 %v71_v45, %v55_v44 }
  0x4f   :  { %516 = vmatpush1.bf16.msra.mxu0 %v515_v3  ;;  %580 = vmatpush1.bf16.msra.mxu1 %v515_v3  ;;  %v125_v3 = vmul.f32 0.70710677, %v109_v57 }
  0x50   :  { %518 = vmatprep.subr.bf16.mxu0 %v517_v4  ;;  %582 = vmatprep.subr.bf16.mxu1 %v517_v4  ;;  %v79_v4 = vadd.f32 %v63_v61, %v47_v60  ;;  %v103_v60 = vmul.f32 0.70710677, %v87_v52  ;;  %v135_v61 = vmul.f32 0.70710677, %v119_v53 }
  0x52   :  { %v95_v14 = vmul.f32 0.70710677, %v79_v4 }
  0x53   :  { %520 = vmatpush1.bf16.msra.mxu0 %v519_v9  ;;  %584 = vmatpush1.bf16.msra.mxu1 %v519_v9  ;;  %v65_v9 = vld [vmem:[#allocation2 + $0x98] sm:$0xff] }
  0x54   :  { %522 = vmatprep.subr.bf16.mxu0 %v521_v10  ;;  %586 = vmatprep.subr.bf16.mxu1 %v521_v10  ;;  %v92_v10 = vmul.f32 0.70710677, %v76_v0  ;;  %v113_v17 = vsub.f32 %v49_v8, %v65_v9 }
  0x57   :  { %524 = vmatpush1.bf16.msra.mxu0 %v523_v15  ;;  %588 = vmatpush1.bf16.msra.mxu1 %v523_v15  ;;  %v127_v15 = vmul.f32 0.70710677, %v111_v5 }
  0x58   :  { %526 = vmatprep.subr.bf16.mxu0 %v525_v16  ;;  %590 = vmatprep.subr.bf16.mxu1 %v525_v16  ;;  %v81_v16 = vadd.f32 %v65_v9, %v49_v8 }
  0x5a   :  { %v97_v26 = vmul.f32 0.70710677, %v81_v16 }
  0x5b   :  { %528 = vmatpush1.bf16.msra.mxu0 %v527_v21  ;;  %592 = vmatpush1.bf16.msra.mxu1 %v527_v21  ;;  %v67_v21 = vld [vmem:[#allocation2 + $0xb8] sm:$0xff] }
  0x5c   :  { %530 = vmatprep.subr.bf16.mxu0 %v529_v22  ;;  %594 = vmatprep.subr.bf16.mxu1 %v529_v22  ;;  %v94_v22 = vmul.f32 0.70710677, %v78_v12  ;;  %v115_v29 = vsub.f32 %v51_v20, %v67_v21 }
  0x5e   :  { %v131_v39 = vmul.f32 0.70710677, %v115_v29 }
  0x5f   :  { %532 = vmatpush1.bf16.msra.mxu0 %v531_v27  ;;  %596 = vmatpush1.bf16.msra.mxu1 %v531_v27  ;;  %v129_v27 = vmul.f32 0.70710677, %v113_v17 }
  0x60   :  { %534 = vmatprep.subr.bf16.mxu0 %v533_v28  ;;  %598 = vmatprep.subr.bf16.mxu1 %v533_v28  ;;  %v83_v28 = vadd.f32 %v67_v21, %v51_v20 }
  0x62   :  { %v99_v38 = vmul.f32 0.70710677, %v83_v28 }
  0x63   :  { %536 = vmatpush1.bf16.msra.mxu0 %v535_v33  ;;  %600 = vmatpush1.bf16.msra.mxu1 %v535_v33  ;;  %v69_v33 = vld [vmem:[#allocation2 + $0xd8] sm:$0xff] }
  0x64   :  { %538 = vmatprep.subr.bf16.mxu0 %v537_v37  ;;  %602 = vmatprep.subr.bf16.mxu1 %v537_v37  ;;  %v114_v37 = vsub.f32 %v50_v30, %v66_v31  ;;  %v85_v40 = vadd.f32 %v69_v33, %v53_v32  ;;  %v117_v41 = vsub.f32 %v53_v32, %v69_v33 }
  0x66   :  { %v130_v47 = vmul.f32 0.70710677, %v114_v37 }
  0x67   :  { %540 = vmatpush1.bf16.msra.mxu0 %v539_v43  ;;  %604 = vmatpush1.bf16.msra.mxu1 %v539_v43  ;;  %v68_v43 = vld [vmem:[#allocation2 + $0xd0] sm:$0xff] }
  0x68   :  { %v84_v48 = vadd.f32 %v68_v43, %v52_v42  ;;  %v116_v49 = vsub.f32 %v52_v42, %v68_v43 }
  0x6a   :  { %265 = vmatmul.mubr.f32.vlgmr.msra.gmra.mrb[0].mxu0 %v88_v50  ;;  %394 = vmatmul.mubr.f32.vlgmr.msra.gmra.mrb[0].mxu1 %v120_v51  ;;  %v101_v50 = vmul.f32 0.70710677, %v85_v40  ;;  %v133_v51 = vmul.f32 0.70710677, %v117_v41  ;;  %v100_v56 = vmul.f32 0.70710677, %v84_v48 }
  0x6b   :  { %270 = vmatprep.mubr.f32.mxu0 %v91_v54  ;;  %399 = vmatprep.mubr.f32.mxu1 %v123_v55  ;;  %v54_v54 = vld [vmem:[#allocation2 + $0xe0] sm:$0xff]  ;;  %v70_v55 = vld [vmem:[#allocation2 + $0xf0] sm:$0xff]  ;;  %v132_v57 = vmul.f32 0.70710677, %v116_v49 }
  0x6c   :  { %v86_v58 = vadd.f32 %v70_v55, %v54_v54  ;;  %v118_v59 = vsub.f32 %v54_v54, %v70_v55 }
  0x6e   :  { %271 = vmatmul.mubr.f32.gmra.mrb[2].mxu0 %v90_v62  ;;  %400 = vmatmul.mubr.f32.gmra.mrb[2].mxu1 %v122_v63  ;;  %v102_v62 = vmul.f32 0.70710677, %v86_v58  ;;  %v134_v63 = vmul.f32 0.70710677, %v118_v59 }
  0x6f   :  { %276 = vmatprep.mubr.f32.mxu0 %v93_v2  ;;  %405 = vmatprep.mubr.f32.mxu1 %v125_v3 }
  0x72   :  { %277 = vmatmul.mubr.f32.gmra.mrb[4].mxu0 %v92_v10  ;;  %406 = vmatmul.mubr.f32.gmra.mrb[4].mxu1 %v124_v11 }
  0x73   :  { %282 = vmatprep.mubr.f32.mxu0 %v95_v14  ;;  %411 = vmatprep.mubr.f32.mxu1 %v127_v15 }
  0x76   :  { %283 = vmatmul.mubr.f32.gmra.mrb[6].mxu0 %v94_v22  ;;  %412 = vmatmul.mubr.f32.gmra.mrb[6].mxu1 %v126_v23 }
  0x77   :  { %288 = vmatprep.mubr.f32.mxu0 %v97_v26  ;;  %417 = vmatprep.mubr.f32.mxu1 %v129_v27 }
  0x7a   :  { %289 = vmatmul.mubr.f32.gmra.mrb[8].mxu0 %v96_v34  ;;  %418 = vmatmul.mubr.f32.gmra.mrb[8].mxu1 %v128_v35 }
  0x7b   :  { %294 = vmatprep.mubr.f32.mxu0 %v99_v38  ;;  %423 = vmatprep.mubr.f32.mxu1 %v131_v39 }
  0x7e   :  { %295 = vmatmul.mubr.f32.gmra.mrb[10].mxu0 %v98_v46  ;;  %424 = vmatmul.mubr.f32.gmra.mrb[10].mxu1 %v130_v47 }
  0x7f   :  { %300 = vmatprep.mubr.f32.mxu0 %v101_v50  ;;  %429 = vmatprep.mubr.f32.mxu1 %v133_v51 }
  0x82   :  { %301 = vmatmul.mubr.f32.gmra.mrb[12].mxu0 %v100_v56  ;;  %430 = vmatmul.mubr.f32.gmra.mrb[12].mxu1 %v132_v57 }
  0x83   :  { %306 = vmatprep.mubr.f32.mxu0 %v103_v60  ;;  %435 = vmatprep.mubr.f32.mxu1 %v135_v61 }
  0x86   :  { %307 = vmatmul.mubr.f32.gmra.mrb[14].mxu0 %v102_v62  ;;  %436 = vmatmul.mubr.f32.gmra.mrb[14].mxu1 %v134_v63 }
 0x13d   :  { %v266_v0 = vpop.f32.mrb[0].mxu0  ;;  %v395_v1 = vpop.f32.mrb[0].mxu1 }
 0x13e   :  { %313 = vst [vmem:[#allocation7] sm:$0xff] %v266_v0  ;;  %443 = vst [vmem:[#allocation7 + $0x80] sm:$0xff] %v395_v1  ;;  %v268_v2 = vpop.f32.mrb[1].mxu0  ;;  %v397_v3 = vpop.f32.mrb[1].mxu1 }
 0x13f   :  { %314 = vst [vmem:[#allocation7 + $0x8] sm:$0xff] %v268_v2  ;;  %444 = vst [vmem:[#allocation7 + $0x88] sm:$0xff] %v397_v3 }
 0x141   :  { %v272_v4 = vpop.f32.mrb[2].mxu0  ;;  %v401_v5 = vpop.f32.mrb[2].mxu1 }
 0x142   :  { %315 = vst [vmem:[#allocation7 + $0x10] sm:$0xff] %v272_v4  ;;  %445 = vst [vmem:[#allocation7 + $0x90] sm:$0xff] %v401_v5  ;;  %v274_v6 = vpop.f32.mrb[3].mxu0  ;;  %v403_v7 = vpop.f32.mrb[3].mxu1 }
 0x143   :  { %316 = vst [vmem:[#allocation7 + $0x18] sm:$0xff] %v274_v6  ;;  %446 = vst [vmem:[#allocation7 + $0x98] sm:$0xff] %v403_v7 }
 0x145   :  { %v278_v8 = vpop.f32.mrb[4].mxu0  ;;  %v407_v9 = vpop.f32.mrb[4].mxu1 }
 0x146   :  { %317 = vst [vmem:[#allocation7 + $0x20] sm:$0xff] %v278_v8  ;;  %447 = vst [vmem:[#allocation7 + $0xa0] sm:$0xff] %v407_v9  ;;  %v280_v10 = vpop.f32.mrb[5].mxu0  ;;  %v409_v11 = vpop.f32.mrb[5].mxu1 }
 0x147   :  { %318 = vst [vmem:[#allocation7 + $0x28] sm:$0xff] %v280_v10  ;;  %448 = vst [vmem:[#allocation7 + $0xa8] sm:$0xff] %v409_v11 }
 0x149   :  { %v284_v12 = vpop.f32.mrb[6].mxu0  ;;  %v413_v13 = vpop.f32.mrb[6].mxu1 }
 0x14a   :  { %319 = vst [vmem:[#allocation7 + $0x30] sm:$0xff] %v284_v12  ;;  %449 = vst [vmem:[#allocation7 + $0xb0] sm:$0xff] %v413_v13  ;;  %v286_v14 = vpop.f32.mrb[7].mxu0  ;;  %v415_v15 = vpop.f32.mrb[7].mxu1 }
 0x14b   :  { %320 = vst [vmem:[#allocation7 + $0x38] sm:$0xff] %v286_v14  ;;  %450 = vst [vmem:[#allocation7 + $0xb8] sm:$0xff] %v415_v15 }
 0x14d   :  { %v290_v16 = vpop.f32.mrb[8].mxu0  ;;  %v419_v17 = vpop.f32.mrb[8].mxu1 }
 0x14e   :  { %321 = vst [vmem:[#allocation7 + $0x40] sm:$0xff] %v290_v16  ;;  %451 = vst [vmem:[#allocation7 + $0xc0] sm:$0xff] %v419_v17  ;;  %v292_v18 = vpop.f32.mrb[9].mxu0  ;;  %v421_v19 = vpop.f32.mrb[9].mxu1 }
 0x14f   :  { %322 = vst [vmem:[#allocation7 + $0x48] sm:$0xff] %v292_v18  ;;  %452 = vst [vmem:[#allocation7 + $0xc8] sm:$0xff] %v421_v19 }
 0x151   :  { %v296_v20 = vpop.f32.mrb[10].mxu0  ;;  %v425_v21 = vpop.f32.mrb[10].mxu1 }
 0x152   :  { %323 = vst [vmem:[#allocation7 + $0x50] sm:$0xff] %v296_v20  ;;  %453 = vst [vmem:[#allocation7 + $0xd0] sm:$0xff] %v425_v21  ;;  %v298_v22 = vpop.f32.mrb[11].mxu0  ;;  %v427_v23 = vpop.f32.mrb[11].mxu1 }
 0x153   :  { %324 = vst [vmem:[#allocation7 + $0x58] sm:$0xff] %v298_v22  ;;  %454 = vst [vmem:[#allocation7 + $0xd8] sm:$0xff] %v427_v23 }
 0x155   :  { %v302_v24 = vpop.f32.mrb[12].mxu0  ;;  %v431_v25 = vpop.f32.mrb[12].mxu1 }
 0x156   :  { %325 = vst [vmem:[#allocation7 + $0x60] sm:$0xff] %v302_v24  ;;  %455 = vst [vmem:[#allocation7 + $0xe0] sm:$0xff] %v431_v25  ;;  %v304_v26 = vpop.f32.mrb[13].mxu0  ;;  %v433_v27 = vpop.f32.mrb[13].mxu1 }
 0x157   :  { %326 = vst [vmem:[#allocation7 + $0x68] sm:$0xff] %v304_v26  ;;  %456 = vst [vmem:[#allocation7 + $0xe8] sm:$0xff] %v433_v27 }
 0x159   :  { %v308_v28 = vpop.f32.mrb[14].mxu0  ;;  %v437_v29 = vpop.f32.mrb[14].mxu1 }
 0x15a   :  { %327 = vst [vmem:[#allocation7 + $0x70] sm:$0xff] %v308_v28  ;;  %457 = vst [vmem:[#allocation7 + $0xf0] sm:$0xff] %v437_v29  ;;  %v310_v30 = vpop.f32.mrb[15].mxu0  ;;  %v439_v31 = vpop.f32.mrb[15].mxu1 }
 0x15b   :  { %328 = vst [vmem:[#allocation7 + $0x78] sm:$0xff] %v310_v30  ;;  %458 = vst [vmem:[#allocation7 + $0xf8] sm:$0xff] %v439_v31 }
 0x15c   :  { %667 = shalt.err (!%p664_p6)
}
 0x15d   :  { %s668_s12 = scalar_lea.hbm %s750_s2, 4096 }
 0x15e   :  { %p669_p7 = scmp.ne.s32.totalorder %s750_s2, %s668_s12  ;;  %p672_p8 = scmp.lt.u32.totalorder %s668_s12, %s750_s2 }
 0x160   :  { %p674_p9 = pnand %p672_p8, %p669_p7 }
 0x162   :  { %677 = shalt.err (!%p674_p9)
}
 0x163   :  { %470 = dma.vmem_to_hbm [thread:$0]  %s465_s8, 4096, %s750_s2, [#allocation4], %s688_s0, %s688_s0, %s689_s5  }
 0x164   :  { %682 = dma.done.wait [#allocation4], 4096  }
 0x165   :  { %683 = vsyncadd [#allocation4], 4294963200 }
 0x166   :  { %474 = vsyncpa [#allocation3], 1 }
 0x167   :  { %475 = vsyncpa [#allocation6], 1 }
 0x168   :  { %476 = vsyncpa [#allocation4], 1 }

</bundles_post_ra>
